<compile_context>
chip_gen: v5e
topology: v5e:2x2
jax: 0.10.0
libtpu: 0.0.40
codegen_flags: <defaults>
</compile_context>

<pallas_src>
import functools

import jax
import jax.numpy as jnp
from jax import lax
from jax.experimental import pallas as pl
from jax.experimental.pallas import tpu as pltpu


def _round_up(v, m):
    return (v + m - 1) // m * m


def _final_layer_kernel(x_ref, scale_ref, bias_ref, w_ref, o_ref, *, eps):
    # x_ref:     (1, tT, H)  activation tile (native dtype, e.g. bf16)
    # scale_ref: (1, 1, H)   per-batch (1 + scale), compute dtype
    # bias_ref:  (1, 1, D)   per-batch fused bias (shift @ W_lin + b_lin), f32
    # w_ref:     (H, D)      final linear weight, compute dtype
    # o_ref:     (1, tT, D)  output tile
    x = x_ref[0].astype(jnp.float32)                        # (tT, H)

    # LayerNorm (no affine, biased variance, eps inside rsqrt).  Two-pass
    # (centered) variance matches the PyTorch reference exactly; the extra
    # XLU reduction is free slack in this HBM-bound kernel.
    mean = jnp.mean(x, axis=-1, keepdims=True)
    xc = x - mean
    var = jnp.mean(xc * xc, axis=-1, keepdims=True)
    xn = xc * lax.rsqrt(var + eps)                          # (tT, H), f32

    # modulate: x * (1 + scale); the +shift term is folded into bias_ref.
    # Downcast + multiply in the compute dtype (packed bf16 VPU on v6e/v7x).
    mod = xn.astype(w_ref.dtype) * scale_ref[0].astype(w_ref.dtype)

    # Final linear on the MXU (compute-dtype operands, f32 accumulation).
    out = jnp.dot(mod, w_ref[...], preferred_element_type=jnp.float32)
    out = out + bias_ref[0].astype(jnp.float32)

    o_ref[0] = out.astype(o_ref.dtype)


def final_layer(x, c, w_ada, b_ada, w_lin, b_lin, *, eps=1e-6,
                compute_dtype=jnp.bfloat16, token_tile=512, out_dtype=None):
    """DiT FinalLayer forward.

    x: (B, T, H), c: (B, H), w_ada: (H, 2H), b_ada: (2H,),
    w_lin: (H, D_out), b_lin: (D_out,)  ->  (B, T, D_out)

    Feed x in bf16 (and leave out_dtype=None) when the surrounding model runs
    bf16 activations -- LN statistics are computed in f32 inside the kernel.
    """
    B, T, H = x.shape
    D_out = w_lin.shape[1]
    out_dtype = x.dtype if out_dtype is None else out_dtype

    # ---- adaLN branch hoisted to XLA (tiny matvec; wastes MXU/VMEM in-kernel).
    c32 = c.astype(jnp.float32)
    silu_c = c32 * jax.nn.sigmoid(c32)
    ada = silu_c @ w_ada.astype(jnp.float32) + b_ada.astype(jnp.float32)
    shift, scale = ada[:, :H], ada[:, H:]
    # Fold shift into the output bias:
    #   (xn*(1+scale) + shift) @ W + b == (xn*(1+scale)) @ W + (shift @ W + b)
    scale1 = (1.0 + scale).astype(compute_dtype).reshape(B, 1, H)
    bias_fused = (shift @ w_lin.astype(jnp.float32)
                  + b_lin.astype(jnp.float32)).reshape(B, 1, D_out)

    # Weight pre-cast once (constant block index -> never re-cast per step).
    w_c = w_lin.astype(compute_dtype)

    # ---- token tiling: bounds VMEM independent of T; keep >= 2 grid steps so
    #      both TensorCores (v7x) get work even at B == 1.
    tT = T if T <= token_tile else token_tile
    if B * pl.cdiv(T, tT) < 2 and T >= 16:
        tT = max(8, _round_up(pl.cdiv(T, 2), 8))
    grid = (B, pl.cdiv(T, tT))

    # ---- explicit VMEM budget (headroom below v7x's 64 MiB physical VMEM).
    x_bytes = jnp.dtype(x.dtype).itemsize
    cw_bytes = jnp.dtype(compute_dtype).itemsize
    o_bytes = jnp.dtype(out_dtype).itemsize
    est = (2 * tT * H * x_bytes              # x tile, double-buffered
           + 2 * tT * D_out * o_bytes        # out tile, double-buffered
           + H * D_out * cw_bytes            # weight (single-buffered)
           + (H * cw_bytes + D_out * 4)      # scale / fused-bias blocks
           + 3 * tT * H * 4                  # in-kernel f32 temporaries
           + tT * max(D_out, 128) * 4        # f32 matmul accumulator
           + (2 << 20))                      # headroom
    try:
        vmem_cap = pltpu.get_tpu_info().vmem_capacity_bytes
    except Exception:  # pragma: no cover - info query unavailable
        vmem_cap = 64 << 20
    vmem_limit = int(min(max(est, 16 << 20),
                         min(40 << 20, int(0.6 * vmem_cap))))

    # ---- advisory cost estimate so XLA schedules around the custom call.
    cost = pl.CostEstimate(
        flops=2 * B * T * H * D_out + 10 * B * T * H,
        transcendentals=B * T,
        bytes_accessed=(B * T * H * x_bytes + B * T * D_out * o_bytes
                        + H * D_out * cw_bytes
                        + B * (H * cw_bytes + D_out * 4)),
    )

    kernel = functools.partial(_final_layer_kernel, eps=eps)

    def _build(single_buffer_consts):
        const_kw = ({"pipeline_mode": pl.Buffered(1)}
                    if single_buffer_consts else {})
        return pl.pallas_call(
            kernel,
            out_shape=jax.ShapeDtypeStruct((B, T, D_out), out_dtype),
            grid_spec=pltpu.PrefetchScalarGridSpec(
                num_scalar_prefetch=0,
                grid=grid,
                in_specs=[
                    pl.BlockSpec((1, tT, H), lambda b, t: (b, t, 0)),       # x
                    pl.BlockSpec((1, 1, H), lambda b, t: (b, 0, 0),
                                 **const_kw),                               # 1+scale
                    pl.BlockSpec((1, 1, D_out), lambda b, t: (b, 0, 0),
                                 **const_kw),                               # fused bias
                    pl.BlockSpec((H, D_out), lambda b, t: (0, 0),
                                 **const_kw),                               # W_lin
                ],
                out_specs=pl.BlockSpec((1, tT, D_out), lambda b, t: (b, t, 0)),
            ),
            compiler_params=pltpu.CompilerParams(
                dimension_semantics=("parallel", "parallel"),
                vmem_limit_bytes=vmem_limit),
            cost_estimate=cost,
        )

    try:
        return _build(True)(x, scale1, bias_fused, w_c)
    except Exception:
        # Fallback: some JAX versions reject Buffered(1); default buffering is
        # functionally identical (just slightly more VMEM for constant blocks).
        return _build(False)(x, scale1, bias_fused, w_c)


def final_layer_ref(x, c, w_ada, b_ada, w_lin, b_lin, *, eps=1e-6):
    """Pure-JAX reference reproducing the PyTorch forward."""
    silu_c = c * jax.nn.sigmoid(c)
    ada = silu_c @ w_ada + b_ada                             # (B, 2H)
    H = x.shape[-1]
    shift, scale = ada[:, :H], ada[:, H:]
    mean = jnp.mean(x, axis=-1, keepdims=True)
    var = jnp.mean((x - mean) ** 2, axis=-1, keepdims=True)
    xn = (x - mean) / jnp.sqrt(var + eps)
    mod = xn * (1.0 + scale[:, None, :]) + shift[:, None, :]
    return mod @ w_lin + b_lin


if __name__ == "__main__":
    # Small shapes consistent with the module.
    B, T = 2, 8
    hidden_size = 128
    patch_size = 2
    out_channels = 8
    D_out = patch_size * patch_size * out_channels           # 32

    key = jax.random.PRNGKey(0)
    kx, kc, kwa, kba, kwl, kbl = jax.random.split(key, 6)

    x = jax.random.normal(kx, (B, T, hidden_size), dtype=jnp.float32)
    c = jax.random.normal(kc, (B, hidden_size), dtype=jnp.float32)

    # PyTorch Linear is y = x @ W^T + b; build the transposed (in, out) layout.
    w_ada = 0.02 * jax.random.normal(kwa, (hidden_size, 2 * hidden_size),
                                     dtype=jnp.float32)
    b_ada = 0.01 * jax.random.normal(kba, (2 * hidden_size,), dtype=jnp.float32)
    w_lin = 0.02 * jax.random.normal(kwl, (hidden_size, D_out), dtype=jnp.float32)
    b_lin = 0.01 * jax.random.normal(kbl, (D_out,), dtype=jnp.float32)

    ref = final_layer_ref(x, c, w_ada, b_ada, w_lin, b_lin)

    # Production path: bf16 activations in / bf16 out, bf16 MXU operands with
    # f32 LN statistics and f32 accumulation.
    x_bf16 = x.astype(jnp.bfloat16)
    out_bf16 = jax.block_until_ready(
        final_layer(x_bf16, c, w_ada, b_ada, w_lin, b_lin))
    assert out_bf16.shape == (B, T, D_out), out_bf16.shape
    assert out_bf16.dtype == jnp.bfloat16, out_bf16.dtype
    assert jnp.allclose(out_bf16.astype(jnp.float32), ref,
                        atol=3e-2, rtol=3e-2), \
        float(jnp.max(jnp.abs(out_bf16.astype(jnp.float32) - ref)))

    # Full-f32 path for a tight numerical check against the PyTorch semantics.
    out_f32 = jax.block_until_ready(
        final_layer(x, c, w_ada, b_ada, w_lin, b_lin,
                    compute_dtype=jnp.float32))
    assert out_f32.shape == (B, T, D_out), out_f32.shape
    assert jnp.allclose(out_f32, ref, atol=5e-4, rtol=5e-4), \
        float(jnp.max(jnp.abs(out_f32 - ref)))

    print("KERNEL_OK")
</pallas_src>

<mosaic_0001>
module attributes {stable_mosaic.version = 11 : i64} {
  func.func @_final_layer_kernel(%arg0: i32, %arg1: i32, %arg2: memref<1x8x128xbf16, #tpu.memory_space<vmem>>, %arg3: memref<1x1x128xbf16, #tpu.memory_space<vmem>>, %arg4: memref<1x1x32xf32, #tpu.memory_space<vmem>>, %arg5: memref<128x32xbf16, #tpu.memory_space<vmem>>, %arg6: memref<1x8x32xbf16, #tpu.memory_space<vmem>>) attributes {dimension_semantics = [#tpu.dimension_semantics<parallel>, #tpu.dimension_semantics<parallel>], iteration_bounds = array<i64: 2, 1>, scalar_prefetch = 0 : i64, scratch_operands = 0 : i64, tpu.core_type = #tpu.core_type<tc>, window_params = [{transform_indices = @transform_0, window_bounds = array<i64: 1, 8, 128>}, {pipeline_mode = #tpu.pipeline_mode<synchronous>, transform_indices = @transform_1, window_bounds = array<i64: 1, 1, 128>}, {pipeline_mode = #tpu.pipeline_mode<synchronous>, transform_indices = @transform_2, window_bounds = array<i64: 1, 1, 32>}, {pipeline_mode = #tpu.pipeline_mode<synchronous>, transform_indices = @transform_3, window_bounds = array<i64: 128, 32>}, {transform_indices = @transform_4, window_bounds = array<i64: 1, 8, 32>}]} {
    %c0 = arith.constant 0 : index
    %c0_0 = arith.constant 0 : index
    %c0_1 = arith.constant 0 : index
    %0 = vector.load %arg2[%c0, %c0_0, %c0_1] : memref<1x8x128xbf16, #tpu.memory_space<vmem>>, vector<1x8x128xbf16>
    %1 = vector.shape_cast %0 : vector<1x8x128xbf16> to vector<8x128xbf16>
    %2 = arith.extf %1 : vector<8x128xbf16> to vector<8x128xf32>
    %cst = arith.constant dense<0.000000e+00> : vector<8xf32>
    %3 = vector.multi_reduction <add>, %2, %cst [1] : vector<8x128xf32> to vector<8xf32>
    %4 = vector.shape_cast %3 : vector<8xf32> to vector<8x1xf32>
    %cst_2 = arith.constant 1.280000e+02 : f32
    %5 = vector.broadcast %cst_2 : f32 to vector<8x1xf32>
    %6 = arith.divf %4, %5 : vector<8x1xf32>
    %7 = vector.broadcast %6 : vector<8x1xf32> to vector<8x128xf32>
    %8 = arith.subf %2, %7 : vector<8x128xf32>
    %9 = arith.mulf %8, %8 : vector<8x128xf32>
    %cst_3 = arith.constant dense<0.000000e+00> : vector<8xf32>
    %10 = vector.multi_reduction <add>, %9, %cst_3 [1] : vector<8x128xf32> to vector<8xf32>
    %11 = vector.shape_cast %10 : vector<8xf32> to vector<8x1xf32>
    %cst_4 = arith.constant 1.280000e+02 : f32
    %12 = vector.broadcast %cst_4 : f32 to vector<8x1xf32>
    %13 = arith.divf %11, %12 : vector<8x1xf32>
    %cst_5 = arith.constant 9.99999997E-7 : f32
    %14 = vector.broadcast %cst_5 : f32 to vector<8x1xf32>
    %15 = arith.addf %13, %14 : vector<8x1xf32>
    %16 = math.rsqrt %15 : vector<8x1xf32>
    %17 = vector.broadcast %16 : vector<8x1xf32> to vector<8x128xf32>
    %18 = arith.mulf %8, %17 : vector<8x128xf32>
    %19 = arith.truncf %18 : vector<8x128xf32> to vector<8x128xbf16>
    %c0_6 = arith.constant 0 : index
    %c0_7 = arith.constant 0 : index
    %c0_8 = arith.constant 0 : index
    %20 = vector.load %arg3[%c0_6, %c0_7, %c0_8] : memref<1x1x128xbf16, #tpu.memory_space<vmem>>, vector<1x1x128xbf16>
    %21 = vector.shape_cast %20 : vector<1x1x128xbf16> to vector<1x128xbf16>
    %22 = vector.broadcast %21 : vector<1x128xbf16> to vector<8x128xbf16>
    %23 = arith.mulf %19, %22 : vector<8x128xbf16>
    %c0_9 = arith.constant 0 : index
    %c0_10 = arith.constant 0 : index
    %24 = vector.load %arg5[%c0_9, %c0_10] : memref<128x32xbf16, #tpu.memory_space<vmem>>, vector<128x32xbf16>
    %cst_11 = arith.constant dense<0.000000e+00> : vector<8x32xf32>
    %25 = tpu.matmul %23, %24, %cst_11 {dimension_numbers = #tpu.dot_dimension_numbers<[1], [0], [0], [1], [0, 0, 1, 1], [], []>} : vector<8x128xbf16>, vector<128x32xbf16>, vector<8x32xf32> -> vector<8x32xf32>
    %c0_12 = arith.constant 0 : index
    %c0_13 = arith.constant 0 : index
    %c0_14 = arith.constant 0 : index
    %26 = vector.load %arg4[%c0_12, %c0_13, %c0_14] : memref<1x1x32xf32, #tpu.memory_space<vmem>>, vector<1x1x32xf32>
    %27 = vector.shape_cast %26 : vector<1x1x32xf32> to vector<1x32xf32>
    %28 = vector.broadcast %27 : vector<1x32xf32> to vector<8x32xf32>
    %29 = arith.addf %25, %28 : vector<8x32xf32>
    %30 = arith.truncf %29 : vector<8x32xf32> to vector<8x32xbf16>
    %c0_15 = arith.constant 0 : index
    %c0_16 = arith.constant 0 : index
    %c0_17 = arith.constant 0 : index
    %31 = vector.load %arg6[%c0_15, %c0_16, %c0_17] : memref<1x8x32xbf16, #tpu.memory_space<vmem>>, vector<1x8x32xbf16>
    %32 = vector.shape_cast %31 : vector<1x8x32xbf16> to vector<8x32xbf16>
    %33 = vector.shape_cast %30 : vector<8x32xbf16> to vector<1x8x32xbf16>
    tpu.vector_store %arg6[%c0_15, %c0_16, %c0_17], %33 {strides = array<i32>} : memref<1x8x32xbf16, #tpu.memory_space<vmem>>, vector<1x8x32xbf16>,
    return
  }
  func.func @transform_0(%arg0: i32, %arg1: i32) -> (i32, i32, i32) {
    %c0_i32 = arith.constant 0 : i32
    %c0_i32_0 = arith.constant 0 : i32
    return %arg0, %arg1, %c0_i32 : i32, i32, i32
  }
  func.func @transform_1(%arg0: i32, %arg1: i32) -> (i32, i32, i32) {
    %c0_i32 = arith.constant 0 : i32
    %c0_i32_0 = arith.constant 0 : i32
    %c0_i32_1 = arith.constant 0 : i32
    return %arg0, %c0_i32, %c0_i32_0 : i32, i32, i32
  }
  func.func @transform_2(%arg0: i32, %arg1: i32) -> (i32, i32, i32) {
    %c0_i32 = arith.constant 0 : i32
    %c0_i32_0 = arith.constant 0 : i32
    %c0_i32_1 = arith.constant 0 : i32
    return %arg0, %c0_i32, %c0_i32_0 : i32, i32, i32
  }
  func.func @transform_3(%arg0: i32, %arg1: i32) -> (i32, i32) {
    %c0_i32 = arith.constant 0 : i32
    %c0_i32_0 = arith.constant 0 : i32
    %c0_i32_1 = arith.constant 0 : i32
    return %c0_i32, %c0_i32_0 : i32, i32
  }
  func.func @transform_4(%arg0: i32, %arg1: i32) -> (i32, i32, i32) {
    %c0_i32 = arith.constant 0 : i32
    %c0_i32_0 = arith.constant 0 : i32
    return %arg0, %arg1, %c0_i32 : i32, i32, i32
  }
}

module attributes {stable_mosaic.version = 11 : i64} {
  func.func @_final_layer_kernel(%arg0: i32, %arg1: i32, %arg2: memref<1x8x128xbf16, #tpu.memory_space<vmem>>, %arg3: memref<1x1x128xbf16, #tpu.memory_space<vmem>>, %arg4: memref<1x1x32xf32, #tpu.memory_space<vmem>>, %arg5: memref<128x32xbf16, #tpu.memory_space<vmem>>, %arg6: memref<1x8x32xbf16, #tpu.memory_space<vmem>>) attributes {dimension_semantics = [#tpu.dimension_semantics<parallel>, #tpu.dimension_semantics<parallel>], iteration_bounds = array<i64: 2, 1>, scalar_prefetch = 0 : i64, scratch_operands = 0 : i64, tpu.core_type = #tpu.core_type<tc>, window_params = [{transform_indices = @transform_0, window_bounds = array<i64: 1, 8, 128>}, {transform_indices = @transform_1, window_bounds = array<i64: 1, 1, 128>}, {transform_indices = @transform_2, window_bounds = array<i64: 1, 1, 32>}, {pipeline_mode = #tpu.pipeline_mode<synchronous>, transform_indices = @transform_3, window_bounds = array<i64: 128, 32>}, {transform_indices = @transform_4, window_bounds = array<i64: 1, 8, 32>}]} {
    %c0 = arith.constant 0 : index
    %c0_0 = arith.constant 0 : index
    %c0_1 = arith.constant 0 : index
    %0 = vector.load %arg2[%c0, %c0_0, %c0_1] : memref<1x8x128xbf16, #tpu.memory_space<vmem>>, vector<1x8x128xbf16>
    %1 = vector.shape_cast %0 : vector<1x8x128xbf16> to vector<8x128xbf16>
    %2 = arith.extf %1 : vector<8x128xbf16> to vector<8x128xf32>
    %cst = arith.constant dense<0.000000e+00> : vector<8xf32>
    %3 = vector.multi_reduction <add>, %2, %cst [1] : vector<8x128xf32> to vector<8xf32>
    %4 = vector.shape_cast %3 : vector<8xf32> to vector<8x1xf32>
    %cst_2 = arith.constant 1.280000e+02 : f32
    %5 = vector.broadcast %cst_2 : f32 to vector<8x1xf32>
    %6 = arith.divf %4, %5 : vector<8x1xf32>
    %7 = vector.broadcast %6 : vector<8x1xf32> to vector<8x128xf32>
    %8 = arith.subf %2, %7 : vector<8x128xf32>
    %9 = arith.mulf %8, %8 : vector<8x128xf32>
    %cst_3 = arith.constant dense<0.000000e+00> : vector<8xf32>
    %10 = vector.multi_reduction <add>, %9, %cst_3 [1] : vector<8x128xf32> to vector<8xf32>
    %11 = vector.shape_cast %10 : vector<8xf32> to vector<8x1xf32>
    %cst_4 = arith.constant 1.280000e+02 : f32
    %12 = vector.broadcast %cst_4 : f32 to vector<8x1xf32>
    %13 = arith.divf %11, %12 : vector<8x1xf32>
    %cst_5 = arith.constant 9.99999997E-7 : f32
    %14 = vector.broadcast %cst_5 : f32 to vector<8x1xf32>
    %15 = arith.addf %13, %14 : vector<8x1xf32>
    %16 = math.rsqrt %15 : vector<8x1xf32>
    %17 = vector.broadcast %16 : vector<8x1xf32> to vector<8x128xf32>
    %18 = arith.mulf %8, %17 : vector<8x128xf32>
    %19 = arith.truncf %18 : vector<8x128xf32> to vector<8x128xbf16>
    %c0_6 = arith.constant 0 : index
    %c0_7 = arith.constant 0 : index
    %c0_8 = arith.constant 0 : index
    %20 = vector.load %arg3[%c0_6, %c0_7, %c0_8] : memref<1x1x128xbf16, #tpu.memory_space<vmem>>, vector<1x1x128xbf16>
    %21 = vector.shape_cast %20 : vector<1x1x128xbf16> to vector<1x128xbf16>
    %22 = vector.broadcast %21 : vector<1x128xbf16> to vector<8x128xbf16>
    %23 = arith.mulf %19, %22 : vector<8x128xbf16>
    %c0_9 = arith.constant 0 : index
    %c0_10 = arith.constant 0 : index
    %24 = vector.load %arg5[%c0_9, %c0_10] : memref<128x32xbf16, #tpu.memory_space<vmem>>, vector<128x32xbf16>
    %cst_11 = arith.constant dense<0.000000e+00> : vector<8x32xf32>
    %25 = tpu.matmul %23, %24, %cst_11 {dimension_numbers = #tpu.dot_dimension_numbers<[1], [0], [0], [1], [0, 0, 1, 1], [], []>} : vector<8x128xbf16>, vector<128x32xbf16>, vector<8x32xf32> -> vector<8x32xf32>
    %c0_12 = arith.constant 0 : index
    %c0_13 = arith.constant 0 : index
    %c0_14 = arith.constant 0 : index
    %26 = vector.load %arg4[%c0_12, %c0_13, %c0_14] : memref<1x1x32xf32, #tpu.memory_space<vmem>>, vector<1x1x32xf32>
    %27 = vector.shape_cast %26 : vector<1x1x32xf32> to vector<1x32xf32>
    %28 = vector.broadcast %27 : vector<1x32xf32> to vector<8x32xf32>
    %29 = arith.addf %25, %28 : vector<8x32xf32>
    %30 = arith.truncf %29 : vector<8x32xf32> to vector<8x32xbf16>
    %c0_15 = arith.constant 0 : index
    %c0_16 = arith.constant 0 : index
    %c0_17 = arith.constant 0 : index
    %31 = vector.load %arg6[%c0_15, %c0_16, %c0_17] : memref<1x8x32xbf16, #tpu.memory_space<vmem>>, vector<1x8x32xbf16>
    %32 = vector.shape_cast %31 : vector<1x8x32xbf16> to vector<8x32xbf16>
    %33 = vector.shape_cast %30 : vector<8x32xbf16> to vector<1x8x32xbf16>
    tpu.vector_store %arg6[%c0_15, %c0_16, %c0_17], %33 {strides = array<i32>} : memref<1x8x32xbf16, #tpu.memory_space<vmem>>, vector<1x8x32xbf16>,
    return
  }
  func.func @transform_0(%arg0: i32, %arg1: i32) -> (i32, i32, i32) {
    %c0_i32 = arith.constant 0 : i32
    %c0_i32_0 = arith.constant 0 : i32
    return %arg0, %arg1, %c0_i32 : i32, i32, i32
  }
  func.func @transform_1(%arg0: i32, %arg1: i32) -> (i32, i32, i32) {
    %c0_i32 = arith.constant 0 : i32
    %c0_i32_0 = arith.constant 0 : i32
    %c0_i32_1 = arith.constant 0 : i32
    return %arg0, %c0_i32, %c0_i32_0 : i32, i32, i32
  }
  func.func @transform_2(%arg0: i32, %arg1: i32) -> (i32, i32, i32) {
    %c0_i32 = arith.constant 0 : i32
    %c0_i32_0 = arith.constant 0 : i32
    %c0_i32_1 = arith.constant 0 : i32
    return %arg0, %c0_i32, %c0_i32_0 : i32, i32, i32
  }
  func.func @transform_3(%arg0: i32, %arg1: i32) -> (i32, i32) {
    %c0_i32 = arith.constant 0 : i32
    %c0_i32_0 = arith.constant 0 : i32
    %c0_i32_1 = arith.constant 0 : i32
    return %c0_i32, %c0_i32_0 : i32, i32
  }
  func.func @transform_4(%arg0: i32, %arg1: i32) -> (i32, i32, i32) {
    %c0_i32 = arith.constant 0 : i32
    %c0_i32_0 = arith.constant 0 : i32
    return %arg0, %arg1, %c0_i32 : i32, i32, i32
  }
}

</mosaic_0001>

<bundles_post_ra>
// kernel: tpu_custom_call.1
= control target key start
LH: loop header
LB: loop body
LE: loop exit
PB: predicated region body
PF: predicated region fallthrough
CT: control target
= control target key end

     0   :  { %9 = vsyncpa [#allocation3], 0  ;;  %s836_s0 = inlined_call_operand.vmem [shape: bf16[2,8,128], index: 0, kind: input, shape index: {}]   ;;  %s837_s1 = inlined_call_operand.vmem [shape: bf16[2,1,128], index: 1, kind: input, shape index: {}]   ;;  %s838_s2 = inlined_call_operand.vmem [shape: f32[2,1,32], index: 2, kind: input, shape index: {}]   ;;  %s839_s3 = inlined_call_operand.vmem [shape: bf16[128,32], index: 3, kind: input, shape index: {}]   ;;  %s840_s4 = inlined_call_operand.hbm [shape: bf16[2,8,32], index: 4, kind: output, shape index: {}]  }
   0x1   :  { %11 = vsyncpa [#allocation3 + $0x1], 0  ;;  %s699_s15 = smov 0   ;;  %s701_s16 = smov 0  }
   0x2   :  { %s703_s17 = smov 0   ;;  %s705_s18 = smov 0  }
   0x3   :  { %s707_s19 = smov 0   ;;  %s709_s20 = smov 0  }
   0x4 LB: > { %s481_s21 = sadd.s32 4294967295, %s671_s20   ;;  %s482_s22 = sadd.s32 4294967294, %s671_s20   ;;  %s671_s20 = sphi %s709_s20, %s17_s20   ;;  %s667_s19 = sphi %s707_s19, %s847_s19   ;;  %s663_s18 = sphi %s705_s18, %s846_s18   ;;  %s659_s17 = sphi %s703_s17, %s845_s17   ;;  %s655_s16 = sphi %s701_s16, %s844_s16   ;;  %s651_s15 = sphi %s699_s15, %s843_s15  }
   0x5   : > { %s29_s23 = sadd.s32 1, %s667_s19  ;;  %s139_s24 = sadd.s32 1, %s659_s17 }
   0x6   : > { %p31_p0 = scmp.ge.s32.totalorder %s29_s23, 2  ;;  %p149_p1 = scmp.ne.s32.totalorder %s659_s17, %s655_s16 }
   0x7   : > { %p150_p2 = scmp.eq.s32.totalorder %s481_s21, 1  ;;  %p155_p3 = scmp.ne.s32.totalorder %s655_s16, %s651_s15 }
   0x8   : > { %s849_s23 = smov (%p31_p0, %s29_s23), 0  ;;  %p156_p5 = scmp.eq.s32.totalorder %s482_s22, 1 }
   0x9   : > { %p739_p4 = por %p150_p2, %p149_p1  ;;  %s134_s26 = ssub.s32 %s667_s19, %s849_s23 }
   0xa   : > { %p485_p6 = scmp.ge.s32.totalorder %s671_s20, 1  ;;  %p137_p7 = scmp.eq.s32.totalorder %s134_s26, 0 }
   0xb   : > { %p746_p8 = por %p156_p5, %p155_p3  ;;  %p199_p9 = scmp.lt.s32.totalorder %s671_s20, 3 }
   0xc   : > { %s752_s28 = scalar_select %p137_p7, %s659_s17, %s139_s24  }
   0xd   : > { %p200_p10 = pnand %p485_p6, %p199_p9 }
   0xe   : > { %p233_p11 = scmp.lt.s32.totalorder (!%p200_p10), %s663_s18, 1  ;;  %s230_s22 = sand.u32 (!%p200_p10), 1, %s655_s16  }
   0xf   : > { %203 = sbr.rel (%p200_p10) target bundleno = 431 (0x1af), region = 36  ;;  %s486_s24 = sshll.u32 (!%p200_p10), %s230_s22, 2 }
  0x10   : > { %s521_s26 = sshll.u32 (!%p200_p10), %s663_s18, 2  ;;  %s232_s9 = scalar_lea.vmem (!%p200_p10), [#allocation2], %s486_s24 }
  0x11   : > { %s381_s8 = scalar_lea.hbm (!%p200_p10), %s840_s4, %s521_s26  ;;  %s383_s11 = sshll.u32 (!%p200_p10), %s232_s9, 4  ;;  %s384_s11 = int_to_ptr.vmem [resolvable:$true] %s383_s11 }
  0x12   : > { %s385_s12 = sshll.u32 (!%p200_p10), %s381_s8, 4  ;;  %s386_s12 = int_to_ptr.hbm [resolvable:$true] %s385_s12 }
  0x13   : > { %s607_s13 = sshra.s32 (!%p200_p10), %s386_s12, 4  ;;  %s608_s13 = int_to_ptr.hbm [resolvable:$true] %s607_s13 }
  0x14   : > { %s756_s29 = scalar_select %p233_p11, %s663_s18, 1  ;;  %v673_v2 = vmov 128.0   ;;  %v531_v13 = vld [vmem:[%s839_s3 + $0x38] sm:$0xff]  ;;  %v530_v14 = vld [vmem:[%s839_s3 + $0x30] sm:$0xff]  ;;  %v529_v15 = vld [vmem:[%s839_s3 + $0x28] sm:$0xff]  ;;  %vm367_vm4 = vcmask 257024  }
  0x15   : > { %589 = vrcp.f32 %v673_v2  ;;  %353 = vmatpush.bf16.msra.mxu0 %v531_v13  ;;  %v528_v16 = vld [vmem:[%s839_s3 + $0x20] sm:$0xff]  ;;  %v527_v17 = vld [vmem:[%s839_s3 + $0x18] sm:$0xff]  ;;  %v526_v18 = vld [vmem:[%s839_s3 + $0x10] sm:$0xff]  ;;  %s370_s18 = scalar_lea.sflag [#allocation3], %s230_s22  ;;  %p614_p1 = scmp.lt.s32.totalorder %s608_s13, %s840_s4 }
  0x16   : > { %s487_s30 = sshll.u32 %s756_s29, 2  ;;  %s245_s10 = scalar_lea.vmem %s838_s2, %s756_s29  ;;  %v525_v19 = vld [vmem:[%s839_s3 + $0x8] sm:$0xff]  ;;  %v524_v20 = vld [vmem:[%s839_s3] sm:$0xff] }
  0x17   : > { %s239_s7 = scalar_lea.vmem %s836_s0, %s487_s30  ;;  %s242_s21 = scalar_lea.vmem %s837_s1, %s756_s29  ;;  %v588_v40 = vld [vmem:[%s245_s10] ss:$0 sm:$0xff] }
  0x18   : > { %v246_v0 = vld [vmem:[%s239_s7] sm:$0xf]  ;;  %s609_s29 = scalar_lea.hbm %s608_s13, 4 }
  0x19   : > { %v247_v1 = vunpack.c.l.bf16 %v246_v0  ;;  %354 = vmatpush.bf16.msra.mxu0 %v530_v14  ;;  %v276_v27 = vld [vmem:[%s242_s21] sm:$0x1]  ;;  %p610_p12 = scmp.ne.s32.totalorder %s608_s13, %s609_s29  ;;  %s613_s21 = scalar_lea.hbm %s840_s4, 8 }
  0x1a   : > { %v278_v29 = vpack.i.b16 %v276_v27, %v276_v27  ;;  %p615_p2 = scmp.lt.s32.totalorder %s613_s21, %s609_s29 }
  0x1b   : > { %248 = vadd.xlane.f32.xlu0 %v247_v1  ;;  %v590_v3 = vpop.eup %589  ;;  %p611_p13 = pnand %p610_p12, %p739_p4 }
  0x1c   : > { %v251_v4 = vmul.f32 128.0, %v590_v3  ;;  %vm255_vm0 = vweird.f32 %v590_v3  ;;  %v280_v32 = vperm.slane %v278_v29, 0  ;;  %p616_p3 = por %p615_p2, %p614_p1 }
  0x1d   : > { %355 = vmatpush.bf16.msra.mxu0 %v529_v15  ;;  %p612_p0 = pneg %p611_p13 }
  0x1e   : > { %v252_v5 = vsub.f32 1.0, %v251_v4  ;;  %v282_v36 = vunpack.c.l.bf16 %v280_v32 }
  0x1f   : > { %p617_p5 = pnand %p616_p3, %p612_p0 }
  0x20   : > { %v253_v6 = vmul.f32 %v590_v3, %v252_v5 }
  0x21   : > { %356 = vmatpush.bf16.msra.mxu0 %v528_v16 }
  0x22   : > { %v254_v7 = vadd.f32 %v590_v3, %v253_v6 }
  0x24   : > { %v256_v8 = vsel %vm255_vm0, %v590_v3, %v254_v7 }
  0x25   : > { %357 = vmatpush.bf16.msra.mxu0 %v527_v17 }
  0x29   : > { %358 = vmatpush.bf16.msra.mxu0 %v526_v18 }
  0x2d   : > { %359 = vmatpush.bf16.msra.mxu0 %v525_v19 }
  0x31   : > { %360 = vmatpush.bf16.msra.mxu0 %v524_v20 }
  0x8e   : > { %v249_v9 = vpop.xlane.xlu0 %248 }
  0x8f   : > { %v257_v10 = vmul.f32 %v256_v8, %v249_v9 }
  0x91   : > { %v258_v11 = vsub.f32 %v247_v1, %v257_v10 }
  0x93   : > { %v259_v12 = vmul.f32 %v258_v11, %v258_v11 }
  0x95   : > { %260 = vadd.xlane.f32.xlu0 %v259_v12 }
 0x108   : > { %v261_v21 = vpop.xlane.xlu0 %260 }
 0x109   : > { %v262_v22 = vmul.f32 %v261_v21, %v256_v8 }
 0x10b   : > { %v263_v23 = vadd.f32 1e-06, %v262_v22 }
 0x10d   : > { %591 = vrsqrt.f32 %v263_v23  ;;  %vm270_vm2 = vweird.f32 %v263_v23 }
 0x113   : > { %v592_v24 = vpop.eup %591 }
 0x114   : > { %v265_v25 = vmul.f32 %v592_v24, %v263_v23  ;;  %vm271_vm1 = vweird.f32 %v592_v24 }
 0x115   : > { %vm272_vm3 = vmor %vm270_vm2, %vm271_vm1 }
 0x116   : > { %v266_v26 = vmul.f32 %v592_v24, %v265_v25 }
 0x118   : > { %v267_v28 = vmul.f32 0.5, %v266_v26 }
 0x11a   : > { %v268_v30 = vsub.f32 1.5, %v267_v28 }
 0x11c   : > { %v269_v31 = vmul.f32 %v592_v24, %v268_v30 }
 0x11e   : > { %v273_v33 = vsel %vm272_vm3, %v592_v24, %v269_v31 }
 0x11f   : > { %v274_v34 = vmul.f32 %v273_v33, %v258_v11 }
 0x121   : > { %v275_v35 = vpack.c.bf16 %v274_v34, %v274_v34 }
 0x123   : > { %v281_v37 = vunpack.c.l.bf16 %v275_v35 }
 0x125   : > { %v283_v38 = vmul.f32 %v282_v36, %v281_v37 }
 0x127   : > { %v284_v39 = vpack.c.bf16 %v283_v38, %v283_v38 }
 0x129   : > { %361 = vmatmul.bf16.vlgmr.msra.gmra.mxu0 %v284_v39 }
 0x1a6   : > { %v362_v41 = vpop.f32.mrf.mxu0 }
 0x1a7   : > { %v363_v42 = vadd.f32 %v588_v40, %v362_v41 }
 0x1a9   : > { %v366_v43 = vpack.c.bf16 %v363_v42, %v363_v42 }
 0x1ab   : > { %368 = vst.msk [vmem:[%s232_s9] sm:$0xf] %vm367_vm4, %v366_v43 }
 0x1ac   : > { %620 = shalt.err (!%p617_p5)
}
 0x1ad   : > { %532 = dma.vmem_to_hbm [thread:$0]  (%p739_p4), %s384_s11, 64, %s386_s12, %s370_s18  }
 0x1ae   : > { %v364_v44 = vpop.f32.mrf.mxu0 }
 0x1af PF: > { %p538_p6 = scmp.ge.s32.totalorder %s671_s20, 2  ;;  %s397_s22 = sand.u32 1, %s651_s15  }
 0x1b0   : > { %s398_s30 = scalar_lea.sflag [#allocation3], %s397_s22 }
 0x1b1   : > { %p535_p7 = pnand %p538_p6, %p746_p8 }
 0x1b3   : > { %p536_p9 = pneg %p535_p7 }
 0x1b5   : > { %646 = dma.done.wait (%p536_p9), %s398_s30, 64  }
 0x1b6   : > { %648 = vsyncadd (%p536_p9), %s398_s30, 4294967232  ;;  %s17_s20 = sadd.s32 1, %s671_s20   ;;  %s843_s15 = smov %s655_s16 }
 0x1b7   : > { %p14_p10 = scmp.ge.s32.totalorder %s17_s20, 4   ;;  %s844_s16 = smov %s659_s17 }
 0x1b8   : > { %s845_s17 = smov %s752_s28  ;;  %s846_s18 = smov %s667_s19 }
 0x1b9   : > { %s847_s19 = smov %s849_s23  ;;  %16 = sbr.rel (!%p14_p10) target bundleno = 4 (0x4), region = 77 }
 0x1be   :  { %404 = vsyncpa [#allocation3], 1 }
 0x1bf   :  { %406 = vsyncpa [#allocation3 + $0x1], 1 }

// kernel: tpu_custom_call.1
= control target key start
LH: loop header
LB: loop body
LE: loop exit
PB: predicated region body
PF: predicated region fallthrough
CT: control target
= control target key end

     0   :  { %9 = vsyncpa [#allocation3], 0  ;;  %s830_s0 = inlined_call_operand.vmem [shape: bf16[2,8,128], index: 0, kind: input, shape index: {}]   ;;  %s831_s1 = inlined_call_operand.vmem [shape: bf16[2,1,128], index: 1, kind: input, shape index: {}]   ;;  %s832_s2 = inlined_call_operand.vmem [shape: f32[2,1,32], index: 2, kind: input, shape index: {}]   ;;  %s833_s3 = inlined_call_operand.vmem [shape: bf16[128,32], index: 3, kind: input, shape index: {}]   ;;  %s834_s4 = inlined_call_operand.hbm [shape: bf16[2,8,32], index: 4, kind: output, shape index: {}]  }
   0x1   :  { %11 = vsyncpa [#allocation3 + $0x1], 0  ;;  %s693_s15 = smov 0   ;;  %s695_s16 = smov 0  }
   0x2   :  { %s697_s17 = smov 0   ;;  %s699_s18 = smov 0  }
   0x3   :  { %s701_s19 = smov 0   ;;  %s703_s20 = smov 0  }
   0x4 LB: > { %s475_s21 = sadd.s32 4294967295, %s665_s20   ;;  %s476_s22 = sadd.s32 4294967294, %s665_s20   ;;  %s665_s20 = sphi %s703_s20, %s17_s20   ;;  %s661_s19 = sphi %s701_s19, %s841_s19   ;;  %s657_s18 = sphi %s699_s18, %s840_s18   ;;  %s653_s17 = sphi %s697_s17, %s839_s17   ;;  %s649_s16 = sphi %s695_s16, %s838_s16   ;;  %s645_s15 = sphi %s693_s15, %s837_s15  }
   0x5   : > { %s29_s23 = sadd.s32 1, %s661_s19  ;;  %s139_s24 = sadd.s32 1, %s653_s17 }
   0x6   : > { %p31_p0 = scmp.ge.s32.totalorder %s29_s23, 2  ;;  %p149_p1 = scmp.ne.s32.totalorder %s653_s17, %s649_s16 }
   0x7   : > { %p150_p2 = scmp.eq.s32.totalorder %s475_s21, 1  ;;  %p155_p3 = scmp.ne.s32.totalorder %s649_s16, %s645_s15 }
   0x8   : > { %s843_s23 = smov (%p31_p0, %s29_s23), 0  ;;  %p156_p5 = scmp.eq.s32.totalorder %s476_s22, 1 }
   0x9   : > { %p733_p4 = por %p150_p2, %p149_p1  ;;  %s134_s26 = ssub.s32 %s661_s19, %s843_s23 }
   0xa   : > { %p479_p6 = scmp.ge.s32.totalorder %s665_s20, 1  ;;  %p137_p7 = scmp.eq.s32.totalorder %s134_s26, 0 }
   0xb   : > { %p740_p8 = por %p156_p5, %p155_p3  ;;  %p199_p9 = scmp.lt.s32.totalorder %s665_s20, 3 }
   0xc   : > { %s746_s28 = scalar_select %p137_p7, %s653_s17, %s139_s24  }
   0xd   : > { %p200_p10 = pnand %p479_p6, %p199_p9 }
   0xe   : > { %p233_p11 = scmp.lt.s32.totalorder (!%p200_p10), %s657_s18, 1  ;;  %s230_s22 = sand.u32 (!%p200_p10), 1, %s649_s16  }
   0xf   : > { %203 = sbr.rel (%p200_p10) target bundleno = 431 (0x1af), region = 36  ;;  %s480_s24 = sshll.u32 (!%p200_p10), %s230_s22, 2 }
  0x10   : > { %s515_s26 = sshll.u32 (!%p200_p10), %s657_s18, 2  ;;  %s232_s9 = scalar_lea.vmem (!%p200_p10), [#allocation2], %s480_s24 }
  0x11   : > { %s381_s8 = scalar_lea.hbm (!%p200_p10), %s834_s4, %s515_s26  ;;  %s383_s11 = sshll.u32 (!%p200_p10), %s232_s9, 4  ;;  %s384_s11 = int_to_ptr.vmem [resolvable:$true] %s383_s11 }
  0x12   : > { %s385_s12 = sshll.u32 (!%p200_p10), %s381_s8, 4  ;;  %s386_s12 = int_to_ptr.hbm [resolvable:$true] %s385_s12 }
  0x13   : > { %s601_s13 = sshra.s32 (!%p200_p10), %s386_s12, 4  ;;  %s602_s13 = int_to_ptr.hbm [resolvable:$true] %s601_s13 }
  0x14   : > { %s750_s29 = scalar_select %p233_p11, %s657_s18, 1  ;;  %v667_v2 = vmov 128.0   ;;  %v525_v13 = vld [vmem:[%s833_s3 + $0x38] sm:$0xff]  ;;  %v524_v14 = vld [vmem:[%s833_s3 + $0x30] sm:$0xff]  ;;  %v523_v15 = vld [vmem:[%s833_s3 + $0x28] sm:$0xff]  ;;  %vm367_vm4 = vcmask 257024  }
  0x15   : > { %583 = vrcp.f32 %v667_v2  ;;  %353 = vmatpush.bf16.msra.mxu0 %v525_v13  ;;  %v522_v16 = vld [vmem:[%s833_s3 + $0x20] sm:$0xff]  ;;  %v521_v17 = vld [vmem:[%s833_s3 + $0x18] sm:$0xff]  ;;  %v520_v18 = vld [vmem:[%s833_s3 + $0x10] sm:$0xff]  ;;  %s370_s18 = scalar_lea.sflag [#allocation3], %s230_s22  ;;  %p608_p1 = scmp.lt.s32.totalorder %s602_s13, %s834_s4 }
  0x16   : > { %s481_s30 = sshll.u32 %s750_s29, 2  ;;  %s245_s10 = scalar_lea.vmem %s832_s2, %s750_s29  ;;  %v519_v19 = vld [vmem:[%s833_s3 + $0x8] sm:$0xff]  ;;  %v518_v20 = vld [vmem:[%s833_s3] sm:$0xff] }
  0x17   : > { %s239_s7 = scalar_lea.vmem %s830_s0, %s481_s30  ;;  %s242_s21 = scalar_lea.vmem %s831_s1, %s750_s29  ;;  %v582_v40 = vld [vmem:[%s245_s10] ss:$0 sm:$0xff] }
  0x18   : > { %v246_v0 = vld [vmem:[%s239_s7] sm:$0xf]  ;;  %s603_s29 = scalar_lea.hbm %s602_s13, 4 }
  0x19   : > { %v247_v1 = vunpack.c.l.bf16 %v246_v0  ;;  %354 = vmatpush.bf16.msra.mxu0 %v524_v14  ;;  %v276_v27 = vld [vmem:[%s242_s21] sm:$0x1]  ;;  %p604_p12 = scmp.ne.s32.totalorder %s602_s13, %s603_s29  ;;  %s607_s21 = scalar_lea.hbm %s834_s4, 8 }
  0x1a   : > { %v278_v29 = vpack.i.b16 %v276_v27, %v276_v27  ;;  %p609_p2 = scmp.lt.s32.totalorder %s607_s21, %s603_s29 }
  0x1b   : > { %248 = vadd.xlane.f32.xlu0 %v247_v1  ;;  %v584_v3 = vpop.eup %583  ;;  %p605_p13 = pnand %p604_p12, %p733_p4 }
  0x1c   : > { %v251_v4 = vmul.f32 128.0, %v584_v3  ;;  %vm255_vm0 = vweird.f32 %v584_v3  ;;  %v280_v32 = vperm.slane %v278_v29, 0  ;;  %p610_p3 = por %p609_p2, %p608_p1 }
  0x1d   : > { %355 = vmatpush.bf16.msra.mxu0 %v523_v15  ;;  %p606_p0 = pneg %p605_p13 }
  0x1e   : > { %v252_v5 = vsub.f32 1.0, %v251_v4  ;;  %v282_v36 = vunpack.c.l.bf16 %v280_v32 }
  0x1f   : > { %p611_p5 = pnand %p610_p3, %p606_p0 }
  0x20   : > { %v253_v6 = vmul.f32 %v584_v3, %v252_v5 }
  0x21   : > { %356 = vmatpush.bf16.msra.mxu0 %v522_v16 }
  0x22   : > { %v254_v7 = vadd.f32 %v584_v3, %v253_v6 }
  0x24   : > { %v256_v8 = vsel %vm255_vm0, %v584_v3, %v254_v7 }
  0x25   : > { %357 = vmatpush.bf16.msra.mxu0 %v521_v17 }
  0x29   : > { %358 = vmatpush.bf16.msra.mxu0 %v520_v18 }
  0x2d   : > { %359 = vmatpush.bf16.msra.mxu0 %v519_v19 }
  0x31   : > { %360 = vmatpush.bf16.msra.mxu0 %v518_v20 }
  0x8e   : > { %v249_v9 = vpop.xlane.xlu0 %248 }
  0x8f   : > { %v257_v10 = vmul.f32 %v256_v8, %v249_v9 }
  0x91   : > { %v258_v11 = vsub.f32 %v247_v1, %v257_v10 }
  0x93   : > { %v259_v12 = vmul.f32 %v258_v11, %v258_v11 }
  0x95   : > { %260 = vadd.xlane.f32.xlu0 %v259_v12 }
 0x108   : > { %v261_v21 = vpop.xlane.xlu0 %260 }
 0x109   : > { %v262_v22 = vmul.f32 %v261_v21, %v256_v8 }
 0x10b   : > { %v263_v23 = vadd.f32 1e-06, %v262_v22 }
 0x10d   : > { %585 = vrsqrt.f32 %v263_v23  ;;  %vm270_vm2 = vweird.f32 %v263_v23 }
 0x113   : > { %v586_v24 = vpop.eup %585 }
 0x114   : > { %v265_v25 = vmul.f32 %v586_v24, %v263_v23  ;;  %vm271_vm1 = vweird.f32 %v586_v24 }
 0x115   : > { %vm272_vm3 = vmor %vm270_vm2, %vm271_vm1 }
 0x116   : > { %v266_v26 = vmul.f32 %v586_v24, %v265_v25 }
 0x118   : > { %v267_v28 = vmul.f32 0.5, %v266_v26 }
 0x11a   : > { %v268_v30 = vsub.f32 1.5, %v267_v28 }
 0x11c   : > { %v269_v31 = vmul.f32 %v586_v24, %v268_v30 }
 0x11e   : > { %v273_v33 = vsel %vm272_vm3, %v586_v24, %v269_v31 }
 0x11f   : > { %v274_v34 = vmul.f32 %v273_v33, %v258_v11 }
 0x121   : > { %v275_v35 = vpack.c.bf16 %v274_v34, %v274_v34 }
 0x123   : > { %v281_v37 = vunpack.c.l.bf16 %v275_v35 }
 0x125   : > { %v283_v38 = vmul.f32 %v282_v36, %v281_v37 }
 0x127   : > { %v284_v39 = vpack.c.bf16 %v283_v38, %v283_v38 }
 0x129   : > { %361 = vmatmul.bf16.vlgmr.msra.gmra.mxu0 %v284_v39 }
 0x1a6   : > { %v362_v41 = vpop.f32.mrf.mxu0 }
 0x1a7   : > { %v363_v42 = vadd.f32 %v582_v40, %v362_v41 }
 0x1a9   : > { %v366_v43 = vpack.c.bf16 %v363_v42, %v363_v42 }
 0x1ab   : > { %368 = vst.msk [vmem:[%s232_s9] sm:$0xf] %vm367_vm4, %v366_v43 }
 0x1ac   : > { %614 = shalt.err (!%p611_p5)
}
 0x1ad   : > { %526 = dma.vmem_to_hbm [thread:$0]  (%p733_p4), %s384_s11, 64, %s386_s12, %s370_s18  }
 0x1ae   : > { %v364_v44 = vpop.f32.mrf.mxu0 }
 0x1af PF: > { %p532_p6 = scmp.ge.s32.totalorder %s665_s20, 2  ;;  %s397_s22 = sand.u32 1, %s645_s15  }
 0x1b0   : > { %s398_s30 = scalar_lea.sflag [#allocation3], %s397_s22 }
 0x1b1   : > { %p529_p7 = pnand %p532_p6, %p740_p8 }
 0x1b3   : > { %p530_p9 = pneg %p529_p7 }
 0x1b5   : > { %640 = dma.done.wait (%p530_p9), %s398_s30, 64  }
 0x1b6   : > { %642 = vsyncadd (%p530_p9), %s398_s30, 4294967232  ;;  %s17_s20 = sadd.s32 1, %s665_s20   ;;  %s837_s15 = smov %s649_s16 }
 0x1b7   : > { %p14_p10 = scmp.ge.s32.totalorder %s17_s20, 4   ;;  %s838_s16 = smov %s653_s17 }
 0x1b8   : > { %s839_s17 = smov %s746_s28  ;;  %s840_s18 = smov %s661_s19 }
 0x1b9   : > { %s841_s19 = smov %s843_s23  ;;  %16 = sbr.rel (!%p14_p10) target bundleno = 4 (0x4), region = 77 }
 0x1be   :  { %404 = vsyncpa [#allocation3], 1 }
 0x1bf   :  { %406 = vsyncpa [#allocation3 + $0x1], 1 }

</bundles_post_ra>
